<compile_context>
chip_gen: v5e
topology: v5e:2x2
jax: 0.10.0
libtpu: 0.0.40
codegen_flags: <defaults>
</compile_context>

<pallas_src>
import functools

import jax
import jax.numpy as jnp
from jax.experimental import pallas as pl
from jax.experimental.pallas import tpu as pltpu


LANES = 128


def _round_up(x: int, m: int) -> int:
    return (x + m - 1) // m * m


def _sigmoid_f32(h):
    # One EUP transcendental per element (tanh) instead of exp + divide.
    return 0.5 * (jnp.tanh(0.5 * h) + 1.0)


def _mlp_kernel(x_ref, w1_ref, b1_ref, w2_ref, b2_ref, o_ref):
    # Layer 1: sigmoid(x @ W1 + b1). x arrives f32, cast to bf16 for the MXU;
    # accumulate in f32; bias add + activation in f32.
    x = x_ref[...].astype(jnp.bfloat16)
    h = jnp.dot(x, w1_ref[...], preferred_element_type=jnp.float32)
    h = _sigmoid_f32(h + b1_ref[...])                 # (1, D_pad) broadcasts
    # Layer 2: sigmoid(h @ W2 + b2).  Padded hidden cols (=0.5) hit zero W2
    # rows, so they contribute nothing.
    y = jnp.dot(h.astype(jnp.bfloat16), w2_ref[...],
                preferred_element_type=jnp.float32)
    o_ref[...] = _sigmoid_f32(y + b2_ref[...]).astype(o_ref.dtype)


def _choose_tb(B: int) -> int:
    """Pick the batch tile.

    B <= 128: one tile sized to the batch (rounded to 16 for bf16 packing of
    the output block) -> minimal padding; megacore irrelevant at this scale.
    B  > 128: prefer >=2 grid tiles (v7x megacore), then minimal batch
    padding, then the largest tile (HBM pipelining + per-step overhead).
    """
    if B <= 128:
        return _round_up(max(B, 1), 16)
    best_key, best_tb = None, None
    for tb in (128, 256, 512, 1024):
        n_tiles = pl.cdiv(B, tb)
        pad = n_tiles * tb - B
        key = (n_tiles < 2, pad, -tb)
        if best_key is None or key < best_key:
            best_key, best_tb = key, tb
    return best_tb


@jax.jit
def _pallas_forward(x, w1, b1, w2, b2):
    """Pallas forward.  x:(B,D) f32, w1:(D,D), b1:(D,), w2:(D,C), b2:(C,)."""
    B, D = x.shape
    C = w2.shape[1]

    D_pad = _round_up(D, LANES)
    C_pad = _round_up(C, LANES)

    TB = _choose_tb(B)
    B_pad = _round_up(B, TB)
    n_batch_tiles = B_pad // TB

    mm_dtype = jnp.bfloat16  # native MXU dtype on v6e/v7x; fine on v5e too.

    # x: pad batch rows only (feature dim stays unpadded + f32; cast in-kernel).
    x_p = x if B_pad == B else jnp.pad(x, ((0, B_pad - B), (0, 0)))

    # Weights/biases are tiny -> pad + cast in the wrapper is negligible and
    # keeps them bf16-resident in VMEM.  Zero padding is load-bearing (see
    # header): padded b1 entries and padded W2 rows must stay zero.
    w1_p = jnp.pad(w1, ((0, 0), (0, D_pad - D))).astype(mm_dtype)      # (D, D_pad)
    b1_p = jnp.pad(b1, (0, D_pad - D)).reshape(1, D_pad).astype(jnp.float32)
    w2_p = jnp.pad(w2, ((0, D_pad - D), (0, C_pad - C))).astype(mm_dtype)  # (D_pad, C_pad)
    b2_p = jnp.pad(b2, (0, C_pad - C)).reshape(1, C_pad).astype(jnp.float32)

    bytes_accessed = (B_pad * D * 4          # x stream (f32, unpadded D)
                      + D * D_pad * 2 + D_pad * C_pad * 2   # weights (bf16)
                      + (D_pad + C_pad) * 4                 # biases (f32)
                      + B_pad * C_pad * 2)                  # output (bf16)
    cost = pl.CostEstimate(
        flops=2 * B_pad * D * D_pad + 2 * B_pad * D_pad * C_pad,
        transcendentals=B_pad * (D_pad + C_pad),
        bytes_accessed=bytes_accessed,
    )

    out_padded = pl.pallas_call(
        _mlp_kernel,
        out_shape=jax.ShapeDtypeStruct((B_pad, C_pad), jnp.bfloat16),
        grid_spec=pltpu.PrefetchScalarGridSpec(
            num_scalar_prefetch=0,
            grid=(n_batch_tiles,),
            in_specs=[
                pl.BlockSpec((TB, D), lambda i: (i, 0)),         # x: streamed
                pl.BlockSpec((D, D_pad), lambda i: (0, 0)),      # W1: resident
                pl.BlockSpec((1, D_pad), lambda i: (0, 0)),      # b1: resident
                pl.BlockSpec((D_pad, C_pad), lambda i: (0, 0)),  # W2: resident
                pl.BlockSpec((1, C_pad), lambda i: (0, 0)),      # b2: resident
            ],
            out_specs=pl.BlockSpec((TB, C_pad), lambda i: (i, 0)),
        ),
        compiler_params=pltpu.CompilerParams(
            dimension_semantics=("parallel",)),   # megacore sharding on v7x
        cost_estimate=cost,
    )(x_p, w1_p, b1_p, w2_p, b2_p)

    return out_padded[:B, :C].astype(jnp.float32)


def _reference_forward(x, w1, b1, w2, b2):
    h = jax.nn.sigmoid(x @ w1 + b1)
    return jax.nn.sigmoid(h @ w2 + b2)


_xla_forward = jax.jit(_reference_forward)


def neural_classifier_forward(x, w1, b1, w2, b2, *, min_pallas_batch=512):
    """Public forward.  Small batches use the fused XLA path (pallas_call
    fixed overhead dominates there); large batches use the Pallas kernel."""
    if x.shape[0] < min_pallas_batch:
        return _xla_forward(x, w1, b1, w2, b2)
    return _pallas_forward(x, w1, b1, w2, b2)


if __name__ == "__main__":
    input_size = 32
    n_classes = 8
    batch = 8

    key = jax.random.PRNGKey(0)
    kx, kw1, kb1, kw2, kb2, kx2 = jax.random.split(key, 6)

    # Deterministic init mimicking PyTorch nn.Linear default:
    # U(-1/sqrt(fan_in), 1/sqrt(fan_in)). Weights stored as (in, out).
    bound = 1.0 / jnp.sqrt(input_size)
    w1 = jax.random.uniform(kw1, (input_size, input_size), jnp.float32,
                            -bound, bound)
    b1 = jax.random.uniform(kb1, (input_size,), jnp.float32, -bound, bound)
    w2 = jax.random.uniform(kw2, (input_size, n_classes), jnp.float32,
                            -bound, bound)
    b2 = jax.random.uniform(kb2, (n_classes,), jnp.float32, -bound, bound)

    # --- Small batch: force the Pallas path so the kernel is exercised. ---
    x_small = jax.random.normal(kx, (batch, input_size), jnp.float32)
    out_small = jax.block_until_ready(_pallas_forward(x_small, w1, b1, w2, b2))
    ref_small = _reference_forward(x_small, w1, b1, w2, b2)
    assert out_small.shape == (batch, n_classes)
    assert jnp.allclose(out_small, ref_small, atol=2e-2, rtol=2e-2), \
        "small-batch mismatch vs reference"

    # --- Multi-tile batch: exercises TB selection, grid>=2 and row padding. ---
    x_big = jax.random.normal(kx2, (300, input_size), jnp.float32)
    out_big = jax.block_until_ready(_pallas_forward(x_big, w1, b1, w2, b2))
    ref_big = _reference_forward(x_big, w1, b1, w2, b2)
    assert out_big.shape == (300, n_classes)
    assert jnp.allclose(out_big, ref_big, atol=2e-2, rtol=2e-2), \
        "multi-tile mismatch vs reference"

    # --- Public wrapper dispatch (XLA fallback for tiny batches). ---
    out_dispatch = jax.block_until_ready(
        neural_classifier_forward(x_small, w1, b1, w2, b2))
    assert jnp.allclose(out_dispatch, ref_small, atol=1e-5, rtol=1e-5)

    print("KERNEL_OK")
</pallas_src>

<mosaic_0001>
module attributes {stable_mosaic.version = 11 : i64} {
  func.func @_mlp_kernel(%arg0: i32, %arg1: memref<16x32xf32, #tpu.memory_space<vmem>>, %arg2: memref<32x128xbf16, #tpu.memory_space<vmem>>, %arg3: memref<1x128xf32, #tpu.memory_space<vmem>>, %arg4: memref<128x128xbf16, #tpu.memory_space<vmem>>, %arg5: memref<1x128xf32, #tpu.memory_space<vmem>>, %arg6: memref<16x128xbf16, #tpu.memory_space<vmem>>) attributes {dimension_semantics = [#tpu.dimension_semantics<parallel>], iteration_bounds = array<i64: 1>, scalar_prefetch = 0 : i64, scratch_operands = 0 : i64, tpu.core_type = #tpu.core_type<tc>, window_params = [{transform_indices = @transform_0, window_bounds = array<i64: 16, 32>}, {pipeline_mode = #tpu.pipeline_mode<synchronous>, transform_indices = @transform_1, window_bounds = array<i64: 32, 128>}, {pipeline_mode = #tpu.pipeline_mode<synchronous>, transform_indices = @transform_2, window_bounds = array<i64: 1, 128>}, {pipeline_mode = #tpu.pipeline_mode<synchronous>, transform_indices = @transform_3, window_bounds = array<i64: 128, 128>}, {pipeline_mode = #tpu.pipeline_mode<synchronous>, transform_indices = @transform_4, window_bounds = array<i64: 1, 128>}, {transform_indices = @transform_5, window_bounds = array<i64: 16, 128>}]} {
    %c0 = arith.constant 0 : index
    %c0_0 = arith.constant 0 : index
    %0 = vector.load %arg1[%c0, %c0_0] : memref<16x32xf32, #tpu.memory_space<vmem>>, vector<16x32xf32>
    %1 = arith.truncf %0 : vector<16x32xf32> to vector<16x32xbf16>
    %c0_1 = arith.constant 0 : index
    %c0_2 = arith.constant 0 : index
    %2 = vector.load %arg2[%c0_1, %c0_2] : memref<32x128xbf16, #tpu.memory_space<vmem>>, vector<32x128xbf16>
    %cst = arith.constant dense<0.000000e+00> : vector<16x128xf32>
    %3 = tpu.matmul %1, %2, %cst {dimension_numbers = #tpu.dot_dimension_numbers<[1], [0], [0], [1], [0, 0, 1, 1], [], []>} : vector<16x32xbf16>, vector<32x128xbf16>, vector<16x128xf32> -> vector<16x128xf32>
    %c0_3 = arith.constant 0 : index
    %c0_4 = arith.constant 0 : index
    %4 = vector.load %arg3[%c0_3, %c0_4] : memref<1x128xf32, #tpu.memory_space<vmem>>, vector<1x128xf32>
    %5 = vector.broadcast %4 : vector<1x128xf32> to vector<16x128xf32>
    %6 = arith.addf %3, %5 : vector<16x128xf32>
    %cst_5 = arith.constant 5.000000e-01 : f32
    %7 = vector.broadcast %cst_5 : f32 to vector<16x128xf32>
    %8 = arith.mulf %7, %6 : vector<16x128xf32>
    %9 = math.tanh %8 : vector<16x128xf32>
    %cst_6 = arith.constant 1.000000e+00 : f32
    %10 = vector.broadcast %cst_6 : f32 to vector<16x128xf32>
    %11 = arith.addf %9, %10 : vector<16x128xf32>
    %cst_7 = arith.constant 5.000000e-01 : f32
    %12 = vector.broadcast %cst_7 : f32 to vector<16x128xf32>
    %13 = arith.mulf %12, %11 : vector<16x128xf32>
    %14 = arith.truncf %13 : vector<16x128xf32> to vector<16x128xbf16>
    %c0_8 = arith.constant 0 : index
    %c0_9 = arith.constant 0 : index
    %15 = vector.load %arg4[%c0_8, %c0_9] : memref<128x128xbf16, #tpu.memory_space<vmem>>, vector<128x128xbf16>
    %cst_10 = arith.constant dense<0.000000e+00> : vector<16x128xf32>
    %16 = tpu.matmul %14, %15, %cst_10 {dimension_numbers = #tpu.dot_dimension_numbers<[1], [0], [0], [1], [0, 0, 1, 1], [], []>} : vector<16x128xbf16>, vector<128x128xbf16>, vector<16x128xf32> -> vector<16x128xf32>
    %c0_11 = arith.constant 0 : index
    %c0_12 = arith.constant 0 : index
    %17 = vector.load %arg5[%c0_11, %c0_12] : memref<1x128xf32, #tpu.memory_space<vmem>>, vector<1x128xf32>
    %18 = vector.broadcast %17 : vector<1x128xf32> to vector<16x128xf32>
    %19 = arith.addf %16, %18 : vector<16x128xf32>
    %cst_13 = arith.constant 5.000000e-01 : f32
    %20 = vector.broadcast %cst_13 : f32 to vector<16x128xf32>
    %21 = arith.mulf %20, %19 : vector<16x128xf32>
    %22 = math.tanh %21 : vector<16x128xf32>
    %cst_14 = arith.constant 1.000000e+00 : f32
    %23 = vector.broadcast %cst_14 : f32 to vector<16x128xf32>
    %24 = arith.addf %22, %23 : vector<16x128xf32>
    %cst_15 = arith.constant 5.000000e-01 : f32
    %25 = vector.broadcast %cst_15 : f32 to vector<16x128xf32>
    %26 = arith.mulf %25, %24 : vector<16x128xf32>
    %27 = arith.truncf %26 : vector<16x128xf32> to vector<16x128xbf16>
    %c0_16 = arith.constant 0 : index
    %c0_17 = arith.constant 0 : index
    %28 = vector.load %arg6[%c0_16, %c0_17] : memref<16x128xbf16, #tpu.memory_space<vmem>>, vector<16x128xbf16>
    tpu.vector_store %arg6[%c0_16, %c0_17], %27 {strides = array<i32>} : memref<16x128xbf16, #tpu.memory_space<vmem>>, vector<16x128xbf16>,
    return
  }
  func.func @transform_0(%arg0: i32) -> (i32, i32) {
    %c0_i32 = arith.constant 0 : i32
    %c0_i32_0 = arith.constant 0 : i32
    return %arg0, %c0_i32 : i32, i32
  }
  func.func @transform_1(%arg0: i32) -> (i32, i32) {
    %c0_i32 = arith.constant 0 : i32
    %c0_i32_0 = arith.constant 0 : i32
    %c0_i32_1 = arith.constant 0 : i32
    return %c0_i32, %c0_i32_0 : i32, i32
  }
  func.func @transform_2(%arg0: i32) -> (i32, i32) {
    %c0_i32 = arith.constant 0 : i32
    %c0_i32_0 = arith.constant 0 : i32
    %c0_i32_1 = arith.constant 0 : i32
    return %c0_i32, %c0_i32_0 : i32, i32
  }
  func.func @transform_3(%arg0: i32) -> (i32, i32) {
    %c0_i32 = arith.constant 0 : i32
    %c0_i32_0 = arith.constant 0 : i32
    %c0_i32_1 = arith.constant 0 : i32
    return %c0_i32, %c0_i32_0 : i32, i32
  }
  func.func @transform_4(%arg0: i32) -> (i32, i32) {
    %c0_i32 = arith.constant 0 : i32
    %c0_i32_0 = arith.constant 0 : i32
    %c0_i32_1 = arith.constant 0 : i32
    return %c0_i32, %c0_i32_0 : i32, i32
  }
  func.func @transform_5(%arg0: i32) -> (i32, i32) {
    %c0_i32 = arith.constant 0 : i32
    %c0_i32_0 = arith.constant 0 : i32
    return %arg0, %c0_i32 : i32, i32
  }
}

</mosaic_0001>

<bundles_post_ra>
// kernel: _pallas_forward.1
= control target key start
LH: loop header
LB: loop body
LE: loop exit
PB: predicated region body
PF: predicated region fallthrough
CT: control target
= control target key end

     0   :  { %vm44_vm0 = vcmask 261120   ;;  %s310_s1 = inlined_call_operand.vmem [shape: bf16[32,128], index: 1, kind: input, shape index: {}]   ;;  %s311_s0 = inlined_call_operand.vmem [shape: f32[16,32], index: 0, kind: input, shape index: {}]   ;;  %s312_s3 = inlined_call_operand.vmem [shape: bf16[128,128], index: 3, kind: input, shape index: {}]   ;;  %s313_s2 = inlined_call_operand.vmem [shape: f32[1,128], index: 2, kind: input, shape index: {}]   ;;  %s314_s4 = inlined_call_operand.vmem [shape: f32[1,128], index: 4, kind: input, shape index: {}]   ;;  %s315_s5 = inlined_call_operand.vmem [shape: bf16[16,128], index: 5, kind: output, shape index: {}]  }
   0x1   :  { %v211_v0 = vld [vmem:[%s310_s1 + $0x8] sm:$0xff]  ;;  %v210_v1 = vld [vmem:[%s310_s1] sm:$0xff]  ;;  %v219_v2 = vld [vmem:[%s312_s3 + $0x38] sm:$0xff] }
   0x2   :  { %54 = vmatpush.bf16.msra.mxu0 %v211_v0  ;;  %v21_v3 = vld [vmem:[%s311_s0] sm:$0xff]  ;;  %v22_v4 = vld [vmem:[%s311_s0 + $0x8] sm:$0xff]  ;;  %139 = vmatpush.bf16.msra.mxu1 %v219_v2  ;;  %v218_v5 = vld [vmem:[%s312_s3 + $0x30] sm:$0xff] }
   0x3   :  { %v23_v6 = vpack.c.bf16 %v22_v4, %v21_v3  ;;  %v217_v7 = vld [vmem:[%s312_s3 + $0x28] sm:$0xff]  ;;  %v216_v8 = vld [vmem:[%s312_s3 + $0x20] sm:$0xff]  ;;  %v215_v9 = vld [vmem:[%s312_s3 + $0x18] sm:$0xff] }
   0x4   :  { %v214_v10 = vld [vmem:[%s312_s3 + $0x10] sm:$0xff]  ;;  %v213_v11 = vld [vmem:[%s312_s3 + $0x8] sm:$0xff]  ;;  %v212_v12 = vld [vmem:[%s312_s3] sm:$0xff] }
   0x5   :  { %v225_v13 = vld [vmem:[%s313_s2] ss:$0 sm:$0xff] }
   0x6   :  { %55 = vmatpush.bf16.msra.mxu0 %v210_v1  ;;  %140 = vmatpush.bf16.msra.mxu1 %v218_v5  ;;  %v226_v27 = vld [vmem:[%s314_s4] ss:$0 sm:$0xff] }
   0x9   :  { %177 = vmatmul.msk.bf16.vlgmr.msra.gmra.mxu0 %vm44_vm0, %v23_v6 }
   0xa   :  { %141 = vmatpush.bf16.msra.mxu1 %v217_v7 }
   0xe   :  { %142 = vmatpush.bf16.msra.mxu1 %v216_v8 }
  0x12   :  { %143 = vmatpush.bf16.msra.mxu1 %v215_v9 }
  0x16   :  { %144 = vmatpush.bf16.msra.mxu1 %v214_v10 }
  0x1a   :  { %145 = vmatpush.bf16.msra.mxu1 %v213_v11 }
  0x1e   :  { %146 = vmatpush.bf16.msra.mxu1 %v212_v12 }
  0x86   :  { %v57_v14 = vpop.f32.mrf.mxu0 }
  0x87   :  { %v58_v15 = vadd.f32 %v225_v13, %v57_v14 }
  0x89   :  { %v62_v16 = vmul.f32 0.5, %v58_v15 }
  0x8b   :  { %227 = vtanh.f32 %v62_v16 }
  0x8e   :  { %v59_v17 = vpop.f32.mrf.mxu0 }
  0x8f   :  { %v60_v18 = vadd.f32 %v225_v13, %v59_v17 }
  0x91   :  { %v63_v19 = vmul.f32 0.5, %v60_v18  ;;  %v228_v20 = vpop.eup %227 }
  0x92   :  { %v66_v21 = vadd.f32 1.0, %v228_v20 }
  0x93   :  { %229 = vtanh.f32 %v63_v19 }
  0x94   :  { %v68_v24 = vmul.f32 0.5, %v66_v21 }
  0x99   :  { %v230_v22 = vpop.eup %229 }
  0x9a   :  { %v67_v23 = vadd.f32 1.0, %v230_v22 }
  0x9c   :  { %v69_v25 = vmul.f32 0.5, %v67_v23 }
  0x9e   :  { %v70_v26 = vpack.c.bf16 %v69_v25, %v68_v24 }
  0xa0   :  { %147 = vmatmul.bf16.vlgmr.msra.gmra.mxu1 %v70_v26 }
 0x11d   :  { %v148_v28 = vpop.f32.mrf.mxu1 }
 0x11e   :  { %v149_v29 = vadd.f32 %v226_v27, %v148_v28 }
 0x120   :  { %v153_v30 = vmul.f32 0.5, %v149_v29 }
 0x122   :  { %231 = vtanh.f32 %v153_v30 }
 0x125   :  { %v150_v31 = vpop.f32.mrf.mxu1 }
 0x126   :  { %v151_v32 = vadd.f32 %v226_v27, %v150_v31 }
 0x128   :  { %v154_v33 = vmul.f32 0.5, %v151_v32  ;;  %v232_v34 = vpop.eup %231 }
 0x129   :  { %v157_v35 = vadd.f32 1.0, %v232_v34 }
 0x12a   :  { %233 = vtanh.f32 %v154_v33 }
 0x12b   :  { %v159_v38 = vmul.f32 0.5, %v157_v35 }
 0x130   :  { %v234_v36 = vpop.eup %233 }
 0x131   :  { %v158_v37 = vadd.f32 1.0, %v234_v36 }
 0x133   :  { %v160_v39 = vmul.f32 0.5, %v158_v37 }
 0x135   :  { %v223_v40 = vpack.c.bf16 %v160_v39, %v159_v38 }
 0x137   :  { %224 = vst [vmem:[%s315_s5] sm:$0xff] %v223_v40  }

</bundles_post_ra>
